<compile_context>
chip_gen: v6e
topology: v6e:2x2x1
jax: 0.10.0
libtpu: 0.0.40
codegen_flags: <defaults>
</compile_context>

<pallas_src>
import functools

import jax
import jax.numpy as jnp
from jax.experimental import pallas as pl
from jax.experimental.pallas import tpu as pltpu


def _divisors(n):
    return [d for d in range(1, n + 1) if n % d == 0]


def _ps_wide_kernel(sel_ref, x_ref, o_ref, *, r, c_blk, hg, w_in, w_t, fused):
    # sel_ref: (r, w_t, r*w_t)      one-hot: sel[j, w, w*r + j] = 1
    # x_ref  : (1, c_blk, r*r, hg, w_in)
    # o_ref  : (1, c_blk, hg, r*r*w_in)
    cdt = sel_ref.dtype
    n_full = w_in // w_t
    rem = w_in - n_full * w_t
    chunks = [(t * w_t, w_t) for t in range(n_full)]
    if rem:
        chunks.append((n_full * w_t, rem))          # remainder chunk: slice the selector

    for i in range(r):                               # output row parity
        for (w0, wc) in chunks:                      # lane chunks (<=128 input cols)
            lo = i * (r * w_in) + w0 * r
            if fused:
                # Fuse channels into the MXU M dimension: one dot per (i, j, chunk).
                acc = None
                for j in range(r):
                    lhs = x_ref[0, :, i * r + j, :, w0:w0 + wc].astype(cdt)
                    lhs = lhs.reshape(c_blk * hg, wc)
                    p = jnp.dot(lhs, sel_ref[j, :wc, :r * wc],
                                preferred_element_type=jnp.float32)
                    acc = p if acc is None else acc + p
                o_ref[0, :, :, lo:lo + r * wc] = (
                    acc.reshape(c_blk, hg, r * wc).astype(o_ref.dtype))
            else:
                # Fallback when the sublane-merge reshape is not clean (hg % 8 != 0).
                for c in range(c_blk):
                    acc = None
                    for j in range(r):
                        lhs = x_ref[0, c, i * r + j, :, w0:w0 + wc].astype(cdt)
                        p = jnp.dot(lhs, sel_ref[j, :wc, :r * wc],
                                    preferred_element_type=jnp.float32)
                        acc = p if acc is None else acc + p
                    o_ref[0, c, :, lo:lo + r * wc] = acc.astype(o_ref.dtype)


def _ps_grouped_kernel(sel_ref, x_ref, o_ref, *, r, c_blk, hg, fused):
    # Small-W regime: hs input H rows are packed into the lane dim (free reshape in
    # the wrapper), so stores are full lane_out (>=128) wide.
    # sel_ref: (r*r, lane_in, lane_out)   lane_in = hs*W_in, lane_out = hs*r*r*W_in
    # x_ref  : (1, c_blk, r*r, hg, lane_in)
    # o_ref  : (1, c_blk, hg, lane_out)
    cdt = sel_ref.dtype
    lane_in = x_ref.shape[-1]
    lane_out = o_ref.shape[-1]
    if fused:
        acc = None
        for q in range(r * r):
            lhs = x_ref[0, :, q, :, :].astype(cdt).reshape(c_blk * hg, lane_in)
            p = jnp.dot(lhs, sel_ref[q], preferred_element_type=jnp.float32)
            acc = p if acc is None else acc + p
        o_ref[0, :, :, :] = acc.reshape(c_blk, hg, lane_out).astype(o_ref.dtype)
    else:
        for c in range(c_blk):
            acc = None
            for q in range(r * r):
                p = jnp.dot(x_ref[0, c, q, :, :].astype(cdt), sel_ref[q],
                            preferred_element_type=jnp.float32)
                acc = p if acc is None else acc + p
            o_ref[0, c, :, :] = acc.astype(o_ref.dtype)


def pixel_shuffle_pallas(x, upscale_factor, orig_shape):
    r = int(upscale_factor)
    b, c_in, h_in, w_in = x.shape
    assert c_in % (r * r) == 0, "input channels must be divisible by r^2"
    c_out = c_in // (r * r)
    h_out, w_out = int(orig_shape[0]), int(orig_shape[1])
    assert 0 < h_out <= h_in * r and 0 < w_out <= w_in * r

    if r == 1:  # identity shuffle
        if (h_out, w_out) == (h_in, w_in):
            return x
        return x[:, :, :h_out, :w_out]

    # Dtype used for the one-hot scatter (exact for f32 / bf16 values).
    if x.dtype == jnp.float32 or x.dtype == jnp.bfloat16:
        cdt = x.dtype
    else:
        # TODO(synk): non-float inputs go through f32; exact only within 24-bit mantissa.
        cdt = jnp.float32
    itemsize = x.dtype.itemsize

    # ---- regime selection ------------------------------------------------------
    divs_h = _divisors(h_in)
    wide = (r * w_in >= 128)
    if wide:
        hs = 1
        w_t = min(w_in, 128)                 # lane-chunk width (remainder handled in kernel)
    else:
        cand = [d for d in divs_h if d * r * r * w_in >= 128]
        hs = min(cand) if cand else h_in
        if hs * r * r * w_in > 1024:         # bound selector size / MXU work
            smaller = [d for d in divs_h if d * r * r * w_in <= 1024]
            hs = max(smaller) if smaller else 1
        w_t = w_in                           # unused in grouped regime
    hg_full = h_in // hs
    lane_in = hs * w_in
    lane_out = hs * r * r * w_in

    # ---- VMEM budget (generation aware) ----------------------------------------
    try:
        vmem_cap = int(getattr(pltpu.get_tpu_info(), "vmem_capacity_bytes", 0)) or (64 << 20)
    except Exception:
        vmem_cap = 64 << 20
    budget = min(12 << 20, max(vmem_cap // 8, 2 << 20))   # per-side, per-buffer bytes

    per_ch_row = r * r * w_in * itemsize     # one channel, one input-H row (one side)

    # h_t: divisor of h_in, multiple of hs; (h_t//hs) % 8 == 0 unless the full H fits.
    h_cands = sorted(d for d in divs_h
                     if d % hs == 0 and (d == h_in or (d // hs) % 8 == 0))
    fit = [d for d in h_cands if d * per_ch_row <= budget]
    h_t = max(fit) if fit else h_cands[0]
    fused0 = (h_t // hs) % 8 == 0

    # c_blk: divisor of c_out; cap only the (unrolled) per-channel fallback path.
    c_cap = 256 if fused0 else 16
    c_cands = [d for d in _divisors(c_out) if d <= c_cap]
    c_fit = [d for d in c_cands if d * h_t * per_ch_row <= budget]
    c_blk = max(c_fit) if c_fit else 1
    n_cb = c_out // c_blk

    # Keep >= ~4 grid steps (v7x has 2 TensorCores): prefer splitting H.
    if b * n_cb * (h_in // h_t) < 4:
        for d in sorted([d for d in h_cands if d < h_t], reverse=True):
            if b * n_cb * (h_in // d) >= 4:
                h_t = d
                break
    n_ht = h_in // h_t
    h_g_t = h_t // hs
    fused = (h_g_t % 8 == 0)

    # ---- one-hot lane-scatter selectors (built once; VMEM-resident) -------------
    if wide:
        shape = (r, w_t, r * w_t)
        jj = jax.lax.broadcasted_iota(jnp.int32, shape, 0)
        ww = jax.lax.broadcasted_iota(jnp.int32, shape, 1)
        kk = jax.lax.broadcasted_iota(jnp.int32, shape, 2)
        sel = (kk == ww * r + jj).astype(cdt)
        kernel = functools.partial(_ps_wide_kernel, r=r, c_blk=c_blk, hg=h_g_t,
                                   w_in=w_in, w_t=w_t, fused=fused)
    else:
        shape = (r * r, lane_in, lane_out)
        qq = jax.lax.broadcasted_iota(jnp.int32, shape, 0)
        k1 = jax.lax.broadcasted_iota(jnp.int32, shape, 1)
        k2 = jax.lax.broadcasted_iota(jnp.int32, shape, 2)
        ii, jj = qq // r, qq % r
        hh, ww = k1 // w_in, k1 % w_in
        sel = (k2 == hh * (r * r * w_in) + ii * (r * w_in) + ww * r + jj).astype(cdt)
        kernel = functools.partial(_ps_grouped_kernel, r=r, c_blk=c_blk, hg=h_g_t,
                                   fused=fused)

    # Free reshape: split channels into (c_out, r*r) and merge hs H rows into lanes.
    x5 = x.reshape(b, c_out, r * r, hg_full, lane_in)

    in_side = c_blk * r * r * h_t * w_in * itemsize
    out_side = c_blk * h_t * r * r * w_in * itemsize
    sel_bytes = int(sel.size) * jnp.dtype(cdt).itemsize
    vmem_limit = 2 * (in_side + out_side) + 2 * sel_bytes + (16 << 20)
    vmem_limit = int(max(32 << 20, min(vmem_limit, (vmem_cap * 3) // 4)))

    out5 = pl.pallas_call(
        kernel,
        out_shape=jax.ShapeDtypeStruct((b, c_out, hg_full, lane_out), x.dtype),
        grid_spec=pltpu.PrefetchScalarGridSpec(
            num_scalar_prefetch=0,
            grid=(b, n_cb, n_ht),
            in_specs=[
                pl.BlockSpec(sel.shape, lambda bi, ci, hi: (0, 0, 0)),
                pl.BlockSpec((1, c_blk, r * r, h_g_t, lane_in),
                             lambda bi, ci, hi: (bi, ci, 0, hi, 0)),
            ],
            out_specs=pl.BlockSpec((1, c_blk, h_g_t, lane_out),
                                   lambda bi, ci, hi: (bi, ci, hi, 0)),
        ),
        compiler_params=pltpu.CompilerParams(
            dimension_semantics=("parallel", "parallel", "parallel"),
            vmem_limit_bytes=vmem_limit,
        ),
    )(sel, x5)

    # Free row-major reshape to (B, C, H_in*r, W_in*r).
    y = out5.reshape(b, c_out, h_in * r, w_in * r)
    if h_out == h_in * r and w_out == w_in * r:
        return y                      # no crop -> no extra HBM pass
    # TODO(synk): cropped case still pays one XLA slice pass over the output.
    return y[:, :, :h_out, :w_out]


def _pixel_shuffle_ref(x, r, orig_shape):
    b, c_in, h, w = x.shape
    c = c_in // (r * r)
    y = x.reshape(b, c, r, r, h, w).transpose(0, 1, 4, 2, 5, 3)
    y = y.reshape(b, c, h * r, w * r)
    return y[:, :, : orig_shape[0], : orig_shape[1]]


if __name__ == "__main__":
    key = jax.random.PRNGKey(0)
    # (shape, r, orig_shape, dtype) -- c_in = c_out * r^2.  Cases cover:
    #   0: small-W grouped regime (lane-packed H rows), per-channel fallback, crop
    #   1: wide fused path with 128-lane chunking + remainder chunk, W crop
    #   2: grouped fused path, r=3, bf16, no crop (direct return)
    #   3: wide regime, H not a multiple of 8 (per-channel fallback), crop
    cases = [
        ((2, 16, 8, 8), 2, (13, 15), jnp.float32),
        ((1, 8, 16, 160), 2, (32, 317), jnp.float32),
        ((1, 18, 32, 8), 3, (96, 24), jnp.bfloat16),
        ((1, 4, 10, 64), 2, (17, 120), jnp.float32),
    ]
    for n, (shape, r, orig, dt) in enumerate(cases):
        key, sub = jax.random.split(key)
        x = jax.random.normal(sub, shape, dtype=jnp.float32).astype(dt)
        out = jax.block_until_ready(pixel_shuffle_pallas(x, r, orig))
        ref = _pixel_shuffle_ref(x, r, orig)
        if out.shape != ref.shape:
            raise AssertionError(f"case {n}: shape {out.shape} vs {ref.shape}")
        ok = jnp.allclose(out.astype(jnp.float32), ref.astype(jnp.float32),
                          atol=1e-6, rtol=1e-6)
        if not bool(ok):
            raise AssertionError(f"case {n}: Pallas PixelShuffle mismatch vs reference")
    print("KERNEL_OK")
</pallas_src>

<mosaic_0001>
module attributes {stable_mosaic.version = 11 : i64} {
  func.func @_ps_grouped_kernel(%arg0: i32, %arg1: i32, %arg2: i32, %arg3: memref<4x32x128xf32, #tpu.memory_space<vmem>>, %arg4: memref<1x4x4x2x32xf32, #tpu.memory_space<vmem>>, %arg5: memref<1x4x2x128xf32, #tpu.memory_space<vmem>>) attributes {dimension_semantics = [#tpu.dimension_semantics<parallel>, #tpu.dimension_semantics<parallel>, #tpu.dimension_semantics<parallel>], iteration_bounds = array<i64: 2, 1, 1>, scalar_prefetch = 0 : i64, scratch_operands = 0 : i64, tpu.core_type = #tpu.core_type<tc>, window_params = [{pipeline_mode = #tpu.pipeline_mode<synchronous>, transform_indices = @transform_0, window_bounds = array<i64: 4, 32, 128>}, {transform_indices = @transform_1, window_bounds = array<i64: 1, 4, 4, 2, 32>}, {transform_indices = @transform_2, window_bounds = array<i64: 1, 4, 2, 128>}]} {
    %c0 = arith.constant 0 : index
    %c0_0 = arith.constant 0 : index
    %c0_1 = arith.constant 0 : index
    %c0_2 = arith.constant 0 : index
    %c0_3 = arith.constant 0 : index
    %0 = vector.load %arg4[%c0, %c0_0, %c0_1, %c0_2, %c0_3] : memref<1x4x4x2x32xf32, #tpu.memory_space<vmem>>, vector<1x1x1x2x32xf32>
    %1 = vector.shape_cast %0 : vector<1x1x1x2x32xf32> to vector<2x32xf32>
    %c0_4 = arith.constant 0 : index
    %c0_5 = arith.constant 0 : index
    %c0_6 = arith.constant 0 : index
    %2 = vector.load %arg3[%c0_4, %c0_5, %c0_6] : memref<4x32x128xf32, #tpu.memory_space<vmem>>, vector<1x32x128xf32>
    %3 = vector.shape_cast %2 : vector<1x32x128xf32> to vector<32x128xf32>
    %cst = arith.constant dense<0.000000e+00> : vector<2x128xf32>
    %4 = tpu.matmul %1, %3, %cst {dimension_numbers = #tpu.dot_dimension_numbers<[1], [0], [0], [1], [0, 0, 1, 1], [], []>} : vector<2x32xf32>, vector<32x128xf32>, vector<2x128xf32> -> vector<2x128xf32>
    %c0_7 = arith.constant 0 : index
    %c0_8 = arith.constant 0 : index
    %c1 = arith.constant 1 : index
    %c0_9 = arith.constant 0 : index
    %c0_10 = arith.constant 0 : index
    %5 = vector.load %arg4[%c0_7, %c0_8, %c1, %c0_9, %c0_10] : memref<1x4x4x2x32xf32, #tpu.memory_space<vmem>>, vector<1x1x1x2x32xf32>
    %6 = vector.shape_cast %5 : vector<1x1x1x2x32xf32> to vector<2x32xf32>
    %c1_11 = arith.constant 1 : index
    %c0_12 = arith.constant 0 : index
    %c0_13 = arith.constant 0 : index
    %7 = vector.load %arg3[%c1_11, %c0_12, %c0_13] : memref<4x32x128xf32, #tpu.memory_space<vmem>>, vector<1x32x128xf32>
    %8 = vector.shape_cast %7 : vector<1x32x128xf32> to vector<32x128xf32>
    %cst_14 = arith.constant dense<0.000000e+00> : vector<2x128xf32>
    %9 = tpu.matmul %6, %8, %cst_14 {dimension_numbers = #tpu.dot_dimension_numbers<[1], [0], [0], [1], [0, 0, 1, 1], [], []>} : vector<2x32xf32>, vector<32x128xf32>, vector<2x128xf32> -> vector<2x128xf32>
    %10 = arith.addf %4, %9 : vector<2x128xf32>
    %c0_15 = arith.constant 0 : index
    %c0_16 = arith.constant 0 : index
    %c2 = arith.constant 2 : index
    %c0_17 = arith.constant 0 : index
    %c0_18 = arith.constant 0 : index
    %11 = vector.load %arg4[%c0_15, %c0_16, %c2, %c0_17, %c0_18] : memref<1x4x4x2x32xf32, #tpu.memory_space<vmem>>, vector<1x1x1x2x32xf32>
    %12 = vector.shape_cast %11 : vector<1x1x1x2x32xf32> to vector<2x32xf32>
    %c2_19 = arith.constant 2 : index
    %c0_20 = arith.constant 0 : index
    %c0_21 = arith.constant 0 : index
    %13 = vector.load %arg3[%c2_19, %c0_20, %c0_21] : memref<4x32x128xf32, #tpu.memory_space<vmem>>, vector<1x32x128xf32>
    %14 = vector.shape_cast %13 : vector<1x32x128xf32> to vector<32x128xf32>
    %cst_22 = arith.constant dense<0.000000e+00> : vector<2x128xf32>
    %15 = tpu.matmul %12, %14, %cst_22 {dimension_numbers = #tpu.dot_dimension_numbers<[1], [0], [0], [1], [0, 0, 1, 1], [], []>} : vector<2x32xf32>, vector<32x128xf32>, vector<2x128xf32> -> vector<2x128xf32>
    %16 = arith.addf %10, %15 : vector<2x128xf32>
    %c0_23 = arith.constant 0 : index
    %c0_24 = arith.constant 0 : index
    %c3 = arith.constant 3 : index
    %c0_25 = arith.constant 0 : index
    %c0_26 = arith.constant 0 : index
    %17 = vector.load %arg4[%c0_23, %c0_24, %c3, %c0_25, %c0_26] : memref<1x4x4x2x32xf32, #tpu.memory_space<vmem>>, vector<1x1x1x2x32xf32>
    %18 = vector.shape_cast %17 : vector<1x1x1x2x32xf32> to vector<2x32xf32>
    %c3_27 = arith.constant 3 : index
    %c0_28 = arith.constant 0 : index
    %c0_29 = arith.constant 0 : index
    %19 = vector.load %arg3[%c3_27, %c0_28, %c0_29] : memref<4x32x128xf32, #tpu.memory_space<vmem>>, vector<1x32x128xf32>
    %20 = vector.shape_cast %19 : vector<1x32x128xf32> to vector<32x128xf32>
    %cst_30 = arith.constant dense<0.000000e+00> : vector<2x128xf32>
    %21 = tpu.matmul %18, %20, %cst_30 {dimension_numbers = #tpu.dot_dimension_numbers<[1], [0], [0], [1], [0, 0, 1, 1], [], []>} : vector<2x32xf32>, vector<32x128xf32>, vector<2x128xf32> -> vector<2x128xf32>
    %22 = arith.addf %16, %21 : vector<2x128xf32>
    %c0_31 = arith.constant 0 : index
    %c0_32 = arith.constant 0 : index
    %c0_33 = arith.constant 0 : index
    %c0_34 = arith.constant 0 : index
    %23 = vector.load %arg5[%c0_31, %c0_32, %c0_33, %c0_34] : memref<1x4x2x128xf32, #tpu.memory_space<vmem>>, vector<1x1x2x128xf32>
    %24 = vector.shape_cast %23 : vector<1x1x2x128xf32> to vector<2x128xf32>
    %25 = vector.shape_cast %22 : vector<2x128xf32> to vector<1x1x2x128xf32>
    tpu.vector_store %arg5[%c0_31, %c0_32, %c0_33, %c0_34], %25 {strides = array<i32>} : memref<1x4x2x128xf32, #tpu.memory_space<vmem>>, vector<1x1x2x128xf32>,
    %c0_35 = arith.constant 0 : index
    %c1_36 = arith.constant 1 : index
    %c0_37 = arith.constant 0 : index
    %c0_38 = arith.constant 0 : index
    %c0_39 = arith.constant 0 : index
    %26 = vector.load %arg4[%c0_35, %c1_36, %c0_37, %c0_38, %c0_39] : memref<1x4x4x2x32xf32, #tpu.memory_space<vmem>>, vector<1x1x1x2x32xf32>
    %27 = vector.shape_cast %26 : vector<1x1x1x2x32xf32> to vector<2x32xf32>
    %c0_40 = arith.constant 0 : index
    %c0_41 = arith.constant 0 : index
    %c0_42 = arith.constant 0 : index
    %28 = vector.load %arg3[%c0_40, %c0_41, %c0_42] : memref<4x32x128xf32, #tpu.memory_space<vmem>>, vector<1x32x128xf32>
    %29 = vector.shape_cast %28 : vector<1x32x128xf32> to vector<32x128xf32>
    %cst_43 = arith.constant dense<0.000000e+00> : vector<2x128xf32>
    %30 = tpu.matmul %27, %29, %cst_43 {dimension_numbers = #tpu.dot_dimension_numbers<[1], [0], [0], [1], [0, 0, 1, 1], [], []>} : vector<2x32xf32>, vector<32x128xf32>, vector<2x128xf32> -> vector<2x128xf32>
    %c0_44 = arith.constant 0 : index
    %c1_45 = arith.constant 1 : index
    %c1_46 = arith.constant 1 : index
    %c0_47 = arith.constant 0 : index
    %c0_48 = arith.constant 0 : index
    %31 = vector.load %arg4[%c0_44, %c1_45, %c1_46, %c0_47, %c0_48] : memref<1x4x4x2x32xf32, #tpu.memory_space<vmem>>, vector<1x1x1x2x32xf32>
    %32 = vector.shape_cast %31 : vector<1x1x1x2x32xf32> to vector<2x32xf32>
    %c1_49 = arith.constant 1 : index
    %c0_50 = arith.constant 0 : index
    %c0_51 = arith.constant 0 : index
    %33 = vector.load %arg3[%c1_49, %c0_50, %c0_51] : memref<4x32x128xf32, #tpu.memory_space<vmem>>, vector<1x32x128xf32>
    %34 = vector.shape_cast %33 : vector<1x32x128xf32> to vector<32x128xf32>
    %cst_52 = arith.constant dense<0.000000e+00> : vector<2x128xf32>
    %35 = tpu.matmul %32, %34, %cst_52 {dimension_numbers = #tpu.dot_dimension_numbers<[1], [0], [0], [1], [0, 0, 1, 1], [], []>} : vector<2x32xf32>, vector<32x128xf32>, vector<2x128xf32> -> vector<2x128xf32>
    %36 = arith.addf %30, %35 : vector<2x128xf32>
    %c0_53 = arith.constant 0 : index
    %c1_54 = arith.constant 1 : index
    %c2_55 = arith.constant 2 : index
    %c0_56 = arith.constant 0 : index
    %c0_57 = arith.constant 0 : index
    %37 = vector.load %arg4[%c0_53, %c1_54, %c2_55, %c0_56, %c0_57] : memref<1x4x4x2x32xf32, #tpu.memory_space<vmem>>, vector<1x1x1x2x32xf32>
    %38 = vector.shape_cast %37 : vector<1x1x1x2x32xf32> to vector<2x32xf32>
    %c2_58 = arith.constant 2 : index
    %c0_59 = arith.constant 0 : index
    %c0_60 = arith.constant 0 : index
    %39 = vector.load %arg3[%c2_58, %c0_59, %c0_60] : memref<4x32x128xf32, #tpu.memory_space<vmem>>, vector<1x32x128xf32>
    %40 = vector.shape_cast %39 : vector<1x32x128xf32> to vector<32x128xf32>
    %cst_61 = arith.constant dense<0.000000e+00> : vector<2x128xf32>
    %41 = tpu.matmul %38, %40, %cst_61 {dimension_numbers = #tpu.dot_dimension_numbers<[1], [0], [0], [1], [0, 0, 1, 1], [], []>} : vector<2x32xf32>, vector<32x128xf32>, vector<2x128xf32> -> vector<2x128xf32>
    %42 = arith.addf %36, %41 : vector<2x128xf32>
    %c0_62 = arith.constant 0 : index
    %c1_63 = arith.constant 1 : index
    %c3_64 = arith.constant 3 : index
    %c0_65 = arith.constant 0 : index
    %c0_66 = arith.constant 0 : index
    %43 = vector.load %arg4[%c0_62, %c1_63, %c3_64, %c0_65, %c0_66] : memref<1x4x4x2x32xf32, #tpu.memory_space<vmem>>, vector<1x1x1x2x32xf32>
    %44 = vector.shape_cast %43 : vector<1x1x1x2x32xf32> to vector<2x32xf32>
    %c3_67 = arith.constant 3 : index
    %c0_68 = arith.constant 0 : index
    %c0_69 = arith.constant 0 : index
    %45 = vector.load %arg3[%c3_67, %c0_68, %c0_69] : memref<4x32x128xf32, #tpu.memory_space<vmem>>, vector<1x32x128xf32>
    %46 = vector.shape_cast %45 : vector<1x32x128xf32> to vector<32x128xf32>
    %cst_70 = arith.constant dense<0.000000e+00> : vector<2x128xf32>
    %47 = tpu.matmul %44, %46, %cst_70 {dimension_numbers = #tpu.dot_dimension_numbers<[1], [0], [0], [1], [0, 0, 1, 1], [], []>} : vector<2x32xf32>, vector<32x128xf32>, vector<2x128xf32> -> vector<2x128xf32>
    %48 = arith.addf %42, %47 : vector<2x128xf32>
    %c0_71 = arith.constant 0 : index
    %c1_72 = arith.constant 1 : index
    %c0_73 = arith.constant 0 : index
    %c0_74 = arith.constant 0 : index
    %49 = vector.load %arg5[%c0_71, %c1_72, %c0_73, %c0_74] : memref<1x4x2x128xf32, #tpu.memory_space<vmem>>, vector<1x1x2x128xf32>
    %50 = vector.shape_cast %49 : vector<1x1x2x128xf32> to vector<2x128xf32>
    %51 = vector.shape_cast %48 : vector<2x128xf32> to vector<1x1x2x128xf32>
    tpu.vector_store %arg5[%c0_71, %c1_72, %c0_73, %c0_74], %51 {strides = array<i32>} : memref<1x4x2x128xf32, #tpu.memory_space<vmem>>, vector<1x1x2x128xf32>,
    %c0_75 = arith.constant 0 : index
    %c2_76 = arith.constant 2 : index
    %c0_77 = arith.constant 0 : index
    %c0_78 = arith.constant 0 : index
    %c0_79 = arith.constant 0 : index
    %52 = vector.load %arg4[%c0_75, %c2_76, %c0_77, %c0_78, %c0_79] : memref<1x4x4x2x32xf32, #tpu.memory_space<vmem>>, vector<1x1x1x2x32xf32>
    %53 = vector.shape_cast %52 : vector<1x1x1x2x32xf32> to vector<2x32xf32>
    %c0_80 = arith.constant 0 : index
    %c0_81 = arith.constant 0 : index
    %c0_82 = arith.constant 0 : index
    %54 = vector.load %arg3[%c0_80, %c0_81, %c0_82] : memref<4x32x128xf32, #tpu.memory_space<vmem>>, vector<1x32x128xf32>
    %55 = vector.shape_cast %54 : vector<1x32x128xf32> to vector<32x128xf32>
    %cst_83 = arith.constant dense<0.000000e+00> : vector<2x128xf32>
    %56 = tpu.matmul %53, %55, %cst_83 {dimension_numbers = #tpu.dot_dimension_numbers<[1], [0], [0], [1], [0, 0, 1, 1], [], []>} : vector<2x32xf32>, vector<32x128xf32>, vector<2x128xf32> -> vector<2x128xf32>
    %c0_84 = arith.constant 0 : index
    %c2_85 = arith.constant 2 : index
    %c1_86 = arith.constant 1 : index
    %c0_87 = arith.constant 0 : index
    %c0_88 = arith.constant 0 : index
    %57 = vector.load %arg4[%c0_84, %c2_85, %c1_86, %c0_87, %c0_88] : memref<1x4x4x2x32xf32, #tpu.memory_space<vmem>>, vector<1x1x1x2x32xf32>
    %58 = vector.shape_cast %57 : vector<1x1x1x2x32xf32> to vector<2x32xf32>
    %c1_89 = arith.constant 1 : index
    %c0_90 = arith.constant 0 : index
    %c0_91 = arith.constant 0 : index
    %59 = vector.load %arg3[%c1_89, %c0_90, %c0_91] : memref<4x32x128xf32, #tpu.memory_space<vmem>>, vector<1x32x128xf32>
    %60 = vector.shape_cast %59 : vector<1x32x128xf32> to vector<32x128xf32>
    %cst_92 = arith.constant dense<0.000000e+00> : vector<2x128xf32>
    %61 = tpu.matmul %58, %60, %cst_92 {dimension_numbers = #tpu.dot_dimension_numbers<[1], [0], [0], [1], [0, 0, 1, 1], [], []>} : vector<2x32xf32>, vector<32x128xf32>, vector<2x128xf32> -> vector<2x128xf32>
    %62 = arith.addf %56, %61 : vector<2x128xf32>
    %c0_93 = arith.constant 0 : index
    %c2_94 = arith.constant 2 : index
    %c2_95 = arith.constant 2 : index
    %c0_96 = arith.constant 0 : index
    %c0_97 = arith.constant 0 : index
    %63 = vector.load %arg4[%c0_93, %c2_94, %c2_95, %c0_96, %c0_97] : memref<1x4x4x2x32xf32, #tpu.memory_space<vmem>>, vector<1x1x1x2x32xf32>
    %64 = vector.shape_cast %63 : vector<1x1x1x2x32xf32> to vector<2x32xf32>
    %c2_98 = arith.constant 2 : index
    %c0_99 = arith.constant 0 : index
    %c0_100 = arith.constant 0 : index
    %65 = vector.load %arg3[%c2_98, %c0_99, %c0_100] : memref<4x32x128xf32, #tpu.memory_space<vmem>>, vector<1x32x128xf32>
    %66 = vector.shape_cast %65 : vector<1x32x128xf32> to vector<32x128xf32>
    %cst_101 = arith.constant dense<0.000000e+00> : vector<2x128xf32>
    %67 = tpu.matmul %64, %66, %cst_101 {dimension_numbers = #tpu.dot_dimension_numbers<[1], [0], [0], [1], [0, 0, 1, 1], [], []>} : vector<2x32xf32>, vector<32x128xf32>, vector<2x128xf32> -> vector<2x128xf32>
    %68 = arith.addf %62, %67 : vector<2x128xf32>
    %c0_102 = arith.constant 0 : index
    %c2_103 = arith.constant 2 : index
    %c3_104 = arith.constant 3 : index
    %c0_105 = arith.constant 0 : index
    %c0_106 = arith.constant 0 : index
    %69 = vector.load %arg4[%c0_102, %c2_103, %c3_104, %c0_105, %c0_106] : memref<1x4x4x2x32xf32, #tpu.memory_space<vmem>>, vector<1x1x1x2x32xf32>
    %70 = vector.shape_cast %69 : vector<1x1x1x2x32xf32> to vector<2x32xf32>
    %c3_107 = arith.constant 3 : index
    %c0_108 = arith.constant 0 : index
    %c0_109 = arith.constant 0 : index
    %71 = vector.load %arg3[%c3_107, %c0_108, %c0_109] : memref<4x32x128xf32, #tpu.memory_space<vmem>>, vector<1x32x128xf32>
    %72 = vector.shape_cast %71 : vector<1x32x128xf32> to vector<32x128xf32>
    %cst_110 = arith.constant dense<0.000000e+00> : vector<2x128xf32>
    %73 = tpu.matmul %70, %72, %cst_110 {dimension_numbers = #tpu.dot_dimension_numbers<[1], [0], [0], [1], [0, 0, 1, 1], [], []>} : vector<2x32xf32>, vector<32x128xf32>, vector<2x128xf32> -> vector<2x128xf32>
    %74 = arith.addf %68, %73 : vector<2x128xf32>
    %c0_111 = arith.constant 0 : index
    %c2_112 = arith.constant 2 : index
    %c0_113 = arith.constant 0 : index
    %c0_114 = arith.constant 0 : index
    %75 = vector.load %arg5[%c0_111, %c2_112, %c0_113, %c0_114] : memref<1x4x2x128xf32, #tpu.memory_space<vmem>>, vector<1x1x2x128xf32>
    %76 = vector.shape_cast %75 : vector<1x1x2x128xf32> to vector<2x128xf32>
    %77 = vector.shape_cast %74 : vector<2x128xf32> to vector<1x1x2x128xf32>
    tpu.vector_store %arg5[%c0_111, %c2_112, %c0_113, %c0_114], %77 {strides = array<i32>} : memref<1x4x2x128xf32, #tpu.memory_space<vmem>>, vector<1x1x2x128xf32>,
    %c0_115 = arith.constant 0 : index
    %c3_116 = arith.constant 3 : index
    %c0_117 = arith.constant 0 : index
    %c0_118 = arith.constant 0 : index
    %c0_119 = arith.constant 0 : index
    %78 = vector.load %arg4[%c0_115, %c3_116, %c0_117, %c0_118, %c0_119] : memref<1x4x4x2x32xf32, #tpu.memory_space<vmem>>, vector<1x1x1x2x32xf32>
    %79 = vector.shape_cast %78 : vector<1x1x1x2x32xf32> to vector<2x32xf32>
    %c0_120 = arith.constant 0 : index
    %c0_121 = arith.constant 0 : index
    %c0_122 = arith.constant 0 : index
    %80 = vector.load %arg3[%c0_120, %c0_121, %c0_122] : memref<4x32x128xf32, #tpu.memory_space<vmem>>, vector<1x32x128xf32>
    %81 = vector.shape_cast %80 : vector<1x32x128xf32> to vector<32x128xf32>
    %cst_123 = arith.constant dense<0.000000e+00> : vector<2x128xf32>
    %82 = tpu.matmul %79, %81, %cst_123 {dimension_numbers = #tpu.dot_dimension_numbers<[1], [0], [0], [1], [0, 0, 1, 1], [], []>} : vector<2x32xf32>, vector<32x128xf32>, vector<2x128xf32> -> vector<2x128xf32>
    %c0_124 = arith.constant 0 : index
    %c3_125 = arith.constant 3 : index
    %c1_126 = arith.constant 1 : index
    %c0_127 = arith.constant 0 : index
    %c0_128 = arith.constant 0 : index
    %83 = vector.load %arg4[%c0_124, %c3_125, %c1_126, %c0_127, %c0_128] : memref<1x4x4x2x32xf32, #tpu.memory_space<vmem>>, vector<1x1x1x2x32xf32>
    %84 = vector.shape_cast %83 : vector<1x1x1x2x32xf32> to vector<2x32xf32>
    %c1_129 = arith.constant 1 : index
    %c0_130 = arith.constant 0 : index
    %c0_131 = arith.constant 0 : index
    %85 = vector.load %arg3[%c1_129, %c0_130, %c0_131] : memref<4x32x128xf32, #tpu.memory_space<vmem>>, vector<1x32x128xf32>
    %86 = vector.shape_cast %85 : vector<1x32x128xf32> to vector<32x128xf32>
    %cst_132 = arith.constant dense<0.000000e+00> : vector<2x128xf32>
    %87 = tpu.matmul %84, %86, %cst_132 {dimension_numbers = #tpu.dot_dimension_numbers<[1], [0], [0], [1], [0, 0, 1, 1], [], []>} : vector<2x32xf32>, vector<32x128xf32>, vector<2x128xf32> -> vector<2x128xf32>
    %88 = arith.addf %82, %87 : vector<2x128xf32>
    %c0_133 = arith.constant 0 : index
    %c3_134 = arith.constant 3 : index
    %c2_135 = arith.constant 2 : index
    %c0_136 = arith.constant 0 : index
    %c0_137 = arith.constant 0 : index
    %89 = vector.load %arg4[%c0_133, %c3_134, %c2_135, %c0_136, %c0_137] : memref<1x4x4x2x32xf32, #tpu.memory_space<vmem>>, vector<1x1x1x2x32xf32>
    %90 = vector.shape_cast %89 : vector<1x1x1x2x32xf32> to vector<2x32xf32>
    %c2_138 = arith.constant 2 : index
    %c0_139 = arith.constant 0 : index
    %c0_140 = arith.constant 0 : index
    %91 = vector.load %arg3[%c2_138, %c0_139, %c0_140] : memref<4x32x128xf32, #tpu.memory_space<vmem>>, vector<1x32x128xf32>
    %92 = vector.shape_cast %91 : vector<1x32x128xf32> to vector<32x128xf32>
    %cst_141 = arith.constant dense<0.000000e+00> : vector<2x128xf32>
    %93 = tpu.matmul %90, %92, %cst_141 {dimension_numbers = #tpu.dot_dimension_numbers<[1], [0], [0], [1], [0, 0, 1, 1], [], []>} : vector<2x32xf32>, vector<32x128xf32>, vector<2x128xf32> -> vector<2x128xf32>
    %94 = arith.addf %88, %93 : vector<2x128xf32>
    %c0_142 = arith.constant 0 : index
    %c3_143 = arith.constant 3 : index
    %c3_144 = arith.constant 3 : index
    %c0_145 = arith.constant 0 : index
    %c0_146 = arith.constant 0 : index
    %95 = vector.load %arg4[%c0_142, %c3_143, %c3_144, %c0_145, %c0_146] : memref<1x4x4x2x32xf32, #tpu.memory_space<vmem>>, vector<1x1x1x2x32xf32>
    %96 = vector.shape_cast %95 : vector<1x1x1x2x32xf32> to vector<2x32xf32>
    %c3_147 = arith.constant 3 : index
    %c0_148 = arith.constant 0 : index
    %c0_149 = arith.constant 0 : index
    %97 = vector.load %arg3[%c3_147, %c0_148, %c0_149] : memref<4x32x128xf32, #tpu.memory_space<vmem>>, vector<1x32x128xf32>
    %98 = vector.shape_cast %97 : vector<1x32x128xf32> to vector<32x128xf32>
    %cst_150 = arith.constant dense<0.000000e+00> : vector<2x128xf32>
    %99 = tpu.matmul %96, %98, %cst_150 {dimension_numbers = #tpu.dot_dimension_numbers<[1], [0], [0], [1], [0, 0, 1, 1], [], []>} : vector<2x32xf32>, vector<32x128xf32>, vector<2x128xf32> -> vector<2x128xf32>
    %100 = arith.addf %94, %99 : vector<2x128xf32>
    %c0_151 = arith.constant 0 : index
    %c3_152 = arith.constant 3 : index
    %c0_153 = arith.constant 0 : index
    %c0_154 = arith.constant 0 : index
    %101 = vector.load %arg5[%c0_151, %c3_152, %c0_153, %c0_154] : memref<1x4x2x128xf32, #tpu.memory_space<vmem>>, vector<1x1x2x128xf32>
    %102 = vector.shape_cast %101 : vector<1x1x2x128xf32> to vector<2x128xf32>
    %103 = vector.shape_cast %100 : vector<2x128xf32> to vector<1x1x2x128xf32>
    tpu.vector_store %arg5[%c0_151, %c3_152, %c0_153, %c0_154], %103 {strides = array<i32>} : memref<1x4x2x128xf32, #tpu.memory_space<vmem>>, vector<1x1x2x128xf32>,
    return
  }
  func.func @transform_0(%arg0: i32, %arg1: i32, %arg2: i32) -> (i32, i32, i32) {
    %c0_i32 = arith.constant 0 : i32
    %c0_i32_0 = arith.constant 0 : i32
    %c0_i32_1 = arith.constant 0 : i32
    %c0_i32_2 = arith.constant 0 : i32
    return %c0_i32, %c0_i32_0, %c0_i32_1 : i32, i32, i32
  }
  func.func @transform_1(%arg0: i32, %arg1: i32, %arg2: i32) -> (i32, i32, i32, i32, i32) {
    %c0_i32 = arith.constant 0 : i32
    %c0_i32_0 = arith.constant 0 : i32
    %c0_i32_1 = arith.constant 0 : i32
    return %arg0, %arg1, %c0_i32, %arg2, %c0_i32_0 : i32, i32, i32, i32, i32
  }
  func.func @transform_2(%arg0: i32, %arg1: i32, %arg2: i32) -> (i32, i32, i32, i32) {
    %c0_i32 = arith.constant 0 : i32
    %c0_i32_0 = arith.constant 0 : i32
    return %arg0, %arg1, %arg2, %c0_i32 : i32, i32, i32, i32
  }
}

</mosaic_0001>

<bundles_post_ra>
// kernel: tpu_custom_call.1
= control target key start
LH: loop header
LB: loop body
LE: loop exit
PB: predicated region body
PF: predicated region fallthrough
CT: control target
= control target key end

     0   :  { %7 = vsyncpa [#allocation3], 0  ;;  %s2584_s0 = inlined_call_operand.hbm [shape: f32[4,32,128], index: 0, kind: input, shape index: {}]   ;;  %s2585_s1 = inlined_call_operand.hbm [shape: f32[2,4,4,2,32], index: 1, kind: input, shape index: {}]   ;;  %s2586_s2 = inlined_call_operand.hbm [shape: f32[2,4,2,128], index: 2, kind: output, shape index: {}]  }
   0x1   :  { %8 = vsyncpa [#allocation6], 0 }
   0x2   :  { %10 = vsyncpa [#allocation6 + $0x1], 0 }
   0x3   :  { %11 = vsyncpa [#allocation4], 0 }
   0x4   :  { %13 = vsyncpa [#allocation4 + $0x1], 0  ;;  %s2169_s9 = smov 0   ;;  %s2171_s10 = smov 0  }
   0x5   :  { %s2173_s11 = smov 0   ;;  %s2175_s12 = smov 0  }
   0x6   :  { %s2177_s13 = smov 0   ;;  %s2179_s14 = smov 0  }
   0x7 LB: > { %s1613_s15 = sadd.s32 4294967295, %s2141_s14   ;;  %s1614_s16 = sadd.s32 4294967294, %s2141_s14   ;;  %s2141_s14 = sphi %s2179_s14, %s19_s14   ;;  %s2137_s13 = sphi %s2177_s13, %s2604_s13   ;;  %s2133_s12 = sphi %s2175_s12, %s2603_s12   ;;  %s2129_s11 = sphi %s2173_s11, %s2602_s11   ;;  %s2125_s10 = sphi %s2171_s10, %s2601_s10   ;;  %s2121_s9 = sphi %s2169_s9, %s2600_s9  }
   0x8   : > { %p83_p0 = scmp.ne.s32.totalorder %s2125_s10, %s2121_s9  ;;  %p2203_p1 = scmp.eq.s32.totalorder %s1613_s15, 0 }
   0x9   : > { %p2207_p2 = scmp.eq.s32.totalorder %s1613_s15, 1  ;;  %p117_p3 = scmp.eq.s32.totalorder %s1614_s16, 1 }
   0xa   : > { %p2213_p4 = por %p2203_p1, %p83_p0  ;;  %p1615_p5 = scmp.ge.s32.totalorder %s2141_s14, 1 }
   0xb   : > { %p2218_p6 = por %p117_p3, %p83_p0  ;;  %p124_p7 = scmp.lt.s32.totalorder %s2141_s14, 3 }
   0xc   : > { %s2590_s19 = scalar_select %p2213_p4, 1, 0 }
   0xd   : > { %s2591_s20 = scalar_select %p2218_p6, 1, 0 }
   0xe   : > { %p2223_p8 = pnand %p1615_p5, %p124_p7  ;;  %s2143_s22 = smov [#allocation2]  }
   0xf   : > { %s136_s23 = sshll.u32 %s2143_s22, 4  ;;  %s38_s25 = sadd.s32 1, %s2137_s13  ;;  %s137_s23 = int_to_ptr.vmem [resolvable:$true] %s136_s23 }
  0x10   : > { %p1930_p9 = pneg %p2223_p8  ;;  %s2014_s26 = scalar_lea.vmem %s137_s23, 2048 }
  0x11   : > { %p2015_p13 = scmp.ne.s32.totalorder %s137_s23, %s2014_s26  ;;  %p2022_p5 = scmp.lt.s32.totalorder %s137_s23, %s137_s23 }
  0x12   : > { %p2232_p11 = pnand %p1930_p9, %p2203_p1  ;;  %p2023_p7 = scmp.lt.s32.totalorder %s2014_s26, %s2014_s26 }
  0x14   : > { %p2005_p12 = pneg %p2232_p11  ;;  %p2024_p6 = por %p2023_p7, %p2022_p5 }
  0x16   : > { %p2017_p0 = pnand %p2015_p13, %p2005_p12 }
  0x18   : > { %p2018_p3 = pneg %p2017_p0 }
  0x1a   : > { %p2025_p4 = pnand %p2024_p6, %p2018_p3 }
  0x1c   : > { %2028 = shalt.err (!%p2025_p4)
}
  0x1d   : > { %s2144_s27 = smov 128   ;;  %s2145_s28 = smov 8  }
  0x1e   : > { %1933 = dma.hbm_to_vmem [thread:$0]  (!%p2232_p11), %s2584_s0, 2048, %s137_s23, [#allocation3], %s2144_s27, %s2144_s27, %s2145_s28  }
  0x1f   : > { %p40_p6 = scmp.ge.s32.totalorder %s38_s25, 2  ;;  %s70_s3 = sadd.s32 1, %s2129_s11 }
  0x20   : > { %p77_p4 = scmp.ne.s32.totalorder %s2129_s11, %s2125_s10  ;;  %p78_p9 = scmp.eq.s32.totalorder %s2141_s14, 0 }
  0x21   : > { %s2606_s25 = smov (%p40_p6, %s38_s25), 0  ;;  %p1943_p0 = scmp.lt.s32.totalorder %s2141_s14, 2 }
  0x22   : > { %p2250_p12 = por %p78_p9, %p77_p4  ;;  %p2256_p13 = por %p2207_p2, %p77_p4 }
  0x23   : > { %s63_s6 = ssub.s32 %s2137_s13, %s2606_s25  ;;  %s150_s7 = sand.u32 1, %s2129_s11  }
  0x24   : > { %p68_p11 = scmp.eq.s32.totalorder %s63_s6, 0  ;;  %s1618_s8 = sshll.u32 %s150_s7, 5 }
  0x25   : > { %s1664_s16 = sshll.u32 %s2137_s13, 9  ;;  %s154_s26 = scalar_lea.vmem [#allocation5], %s1618_s8 }
  0x26   : > { %s2265_s15 = scalar_select %p68_p11, %s2129_s11, %s70_s3  }
  0x27   : > { %s164_s24 = scalar_lea.hbm %s2585_s1, %s1664_s16  ;;  %s165_s27 = sshll.u32 %s154_s26, 4  ;;  %s166_s27 = int_to_ptr.vmem [resolvable:$true] %s165_s27 }
  0x28   : > { %p2273_p2 = pnand %p1943_p0, %p2250_p12  ;;  %s151_s28 = scalar_lea.sflag [#allocation6], %s150_s7 }
  0x29   : > { %s2042_s29 = scalar_lea.vmem %s166_s27, 512  ;;  %s2146_s30 = smov [#allocation5]  }
  0x2a   : > { %p2031_p3 = pneg %p2273_p2  ;;  %p2043_p5 = scmp.ne.s32.totalorder %s166_s27, %s2042_s29 }
  0x2b   : > { %s2047_s3 = sshll.u32 %s2146_s30, 4  ;;  %s2048_s3 = int_to_ptr.vmem [resolvable:$false] %s2047_s3 }
  0x2c   : > { %p2045_p7 = pnand %p2043_p5, %p2031_p3  ;;  %s2049_s6 = scalar_lea.vmem %s2048_s3, 1024 }
  0x2d   : > { %p2050_p4 = scmp.lt.s32.totalorder %s166_s27, %s2048_s3  ;;  %p2051_p9 = scmp.lt.s32.totalorder %s2049_s6, %s2042_s29 }
  0x2e   : > { %p2046_p6 = pneg %p2045_p7 }
  0x2f   : > { %p2052_p11 = por %p2051_p9, %p2050_p4 }
  0x31   : > { %p2053_p10 = pnand %p2052_p11, %p2046_p6 }
  0x33   : > { %2056 = shalt.err (!%p2053_p10)
}
  0x34   : > { %s2147_s4 = smov 32   ;;  %s2148_s8 = smov 2  }
  0x35   : > { %1937 = dma.hbm_to_vmem [thread:$0]  (!%p2273_p2), %s164_s24, 512, %s166_s27, %s151_s28, %s2147_s4, %s2147_s4, %s2148_s8  }
  0x36   : > { %177 = sbr.rel (%p2223_p8) target bundleno = 355 (0x163), region = 28 }
  0x3b   : > { %2108 = dma.done.wait (%p2203_p1), [#allocation3], 2048  }
  0x3c   : > { %2110 = vsyncadd (%p2203_p1), [#allocation3], 4294965248  ;;  %s2288_s7 = sand.u32 1, %s2125_s10   ;;  %p2597_p10 = scmp.ne.s32.totalorder %s2590_s19, 0 }
  0x3d   : > { %s1623_s16 = sshll.u32 %s2288_s7, 5  ;;  %s184_s22 = scalar_lea.sflag [#allocation6], %s2288_s7 }
  0x3e   : > { %s2292_s23 = scalar_lea.vmem [#allocation5], %s1623_s16 }
  0x3f   : > { %2112 = dma.done.wait (%p2597_p10), %s184_s22, 512  }
  0x40   : > { %2114 = vsyncadd (%p2597_p10), %s184_s22, 4294966784  ;;  %v2149_v0 = vmov 0.0   ;;  %vm2150_vm0 = vmmov 0   ;;  %v2304_v1 = vld [vmem:[#allocation2 + $0x38] sm:$0xff]  ;;  %v2308_v3 = vld [vmem:[#allocation2 + $0x30] sm:$0xff]  ;;  %vm222_vm1 = vcmask 261120  }
  0x41   : > { %1746 = vmatprep.subr.mxu0 %v2149_v0  ;;  %1757 = vmatprep.subr.mxu1 %v2149_v0  ;;  %v2306_v2 = vld [vmem:[#allocation2 + $0x18] sm:$0xff]  ;;  %v2312_v4 = vld [vmem:[#allocation2 + $0x10] sm:$0xff]  ;;  %v2316_v5 = vld [vmem:[#allocation2 + $0x28] sm:$0xff]  ;;  %s1624_s17 = sshll.u32 %s2288_s7, 3  ;;  %s1665_s24 = sshll.u32 %s2133_s12, 7 }
  0x42   : > { %1754 = vmatprep.mubr.msk.f32.mxu0 %vm2150_vm0, %v2149_v0  ;;  %1765 = vmatprep.mubr.msk.f32.mxu1 %vm2150_vm0, %v2149_v0  ;;  %v2318_v6 = vld [vmem:[#allocation2 + $0x8] sm:$0xff]  ;;  %v2324_v7 = vld [vmem:[#allocation2 + $0x20] sm:$0xff]  ;;  %v2336_v11 = vld [vmem:[#allocation2 + $0x58] sm:$0xff]  ;;  %s2523_s19 = scalar_lea.vmem [#allocation7], %s1624_s17  ;;  %s2535_s18 = scalar_lea.hbm %s2586_s2, %s1665_s24 }
  0x43   : > { %1747 = vmatpush3.msra.mxu0 %v2304_v1  ;;  %1758 = vmatpush3.msra.mxu1 %v2306_v2  ;;  %v2326_v8 = vld [vmem:[#allocation2] sm:$0xff]  ;;  %v2338_v12 = vld [vmem:[#allocation2 + $0x78] sm:$0xff]  ;;  %v2344_v13 = vld [vmem:[#allocation2 + $0x50] sm:$0xff]  ;;  %s1509_s21 = sshll.u32 %s2523_s19, 4  ;;  %s1493_s28 = scalar_lea.sflag [#allocation4], %s2288_s7  ;;  %s2530_s21 = int_to_ptr.vmem [resolvable:$true] %s1509_s21 }
  0x44   : > { %1748 = vmatprep.subr.mxu0 %v2149_v0  ;;  %1759 = vmatprep.subr.mxu1 %v2149_v0  ;;  %v1625_v9 = vld [vmem:[%s2292_s23 + $0x2] sm:$0x3]  ;;  %v210_v10 = vld [vmem:[%s2292_s23] sm:$0x3]  ;;  %v2346_v14 = vld [vmem:[#allocation2 + $0x70] sm:$0xff]  ;;  %s2057_s29 = scalar_lea.vmem %s2530_s21, 128 }
  0x45   : > { %1749 = vmatpush3.msra.mxu0 %v2308_v3  ;;  %1760 = vmatpush3.msra.mxu1 %v2312_v4  ;;  %v2352_v15 = vld [vmem:[#allocation2 + $0x48] sm:$0xff]  ;;  %v2360_v17 = vld [vmem:[#allocation2 + $0x40] sm:$0xff]  ;;  %v1642_v25 = vld [vmem:[%s2292_s23 + $0x12] sm:$0x3]  ;;  %p2058_p1 = scmp.ne.s32.totalorder %s2530_s21, %s2057_s29  ;;  %s2151_s12 = smov [#allocation7]  }
  0x46   : > { %1750 = vmatprep.subr.mxu0 %v2149_v0  ;;  %1761 = vmatprep.subr.mxu1 %v2149_v0  ;;  %v2354_v16 = vld [vmem:[#allocation2 + $0x68] sm:$0xff]  ;;  %v2364_v18 = vld [vmem:[#allocation2 + $0x60] sm:$0xff]  ;;  %v1641_v26 = vld [vmem:[%s2292_s23 + $0x10] sm:$0x3]  ;;  %s2061_s30 = sshll.u32 %s2151_s12, 4  ;;  %s2062_s30 = int_to_ptr.vmem [resolvable:$false] %s2061_s30 }
  0x47   : > { %1751 = vmatpush3.msra.mxu0 %v2316_v5  ;;  %1762 = vmatpush3.msra.mxu1 %v2318_v6  ;;  %v1628_v19 = vld [vmem:[%s2292_s23 + $0x4] sm:$0x3]  ;;  %v1630_v20 = vld [vmem:[%s2292_s23 + $0x6] sm:$0x3]  ;;  %v1633_v21 = vld [vmem:[%s2292_s23 + $0xa] sm:$0x3]  ;;  %p2059_p8 = pnand %p2058_p1, %p2256_p13  ;;  %p2064_p0 = scmp.lt.s32.totalorder %s2530_s21, %s2062_s30 }
  0x48   : > { %1752 = vmatprep.subr.mxu0 %v2149_v0  ;;  %1763 = vmatprep.subr.mxu1 %v2149_v0  ;;  %v1632_v22 = vld [vmem:[%s2292_s23 + $0x8] sm:$0x3]  ;;  %v1636_v23 = vld [vmem:[%s2292_s23 + $0xc] sm:$0x3]  ;;  %v1638_v24 = vld [vmem:[%s2292_s23 + $0xe] sm:$0x3] }
  0x49   : > { %1753 = vmatpush3.msra.mxu0 %v2324_v7  ;;  %1764 = vmatpush3.msra.mxu1 %v2326_v8  ;;  %v1645_v27 = vld [vmem:[%s2292_s23 + $0x14] sm:$0x3]  ;;  %v1647_v28 = vld [vmem:[%s2292_s23 + $0x16] sm:$0x3]  ;;  %v1651_v29 = vld [vmem:[%s2292_s23 + $0x1a] sm:$0x3]  ;;  %p2060_p12 = pneg %p2059_p8 }
  0x4a   : > { %1755 = vmatmul.mubr.msk.f32.vlgmr.msra.gmra.mxu0 %vm222_vm1, %v1625_v9  ;;  %1768 = vmatprep.subr.mxu0 %v2149_v0  ;;  %v1650_v30 = vld [vmem:[%s2292_s23 + $0x18] sm:$0x3]  ;;  %v1654_v31 = vld [vmem:[%s2292_s23 + $0x1c] sm:$0x3]  ;;  %v1656_v32 = vld [vmem:[%s2292_s23 + $0x1e] sm:$0x3] }
  0x4b   : > { %1779 = vmatprep.subr.mxu1 %v2149_v0  ;;  %1766 = vmatmul.mubr.msk.f32.vlgmr.msra.gmra.mxu1 %vm222_vm1, %v210_v10  ;;  %s2063_s3 = scalar_lea.vmem %s2062_s30, 256 }
  0x4c   : > { %1769 = vmatpush3.msra.mxu0 %v2336_v11  ;;  %1780 = vmatpush3.msra.mxu1 %v2338_v12  ;;  %p2065_p2 = scmp.lt.s32.totalorder %s2063_s3, %s2057_s29 }
  0x4d   : > { %1770 = vmatprep.subr.mxu0 %v2149_v0  ;;  %1781 = vmatprep.subr.mxu1 %v2149_v0 }
  0x4e   : > { %1771 = vmatpush3.msra.mxu0 %v2344_v13  ;;  %1782 = vmatpush3.msra.mxu1 %v2346_v14  ;;  %p2066_p3 = por %p2065_p2, %p2064_p0 }
  0x4f   : > { %1772 = vmatprep.subr.mxu0 %v2149_v0  ;;  %1783 = vmatprep.subr.mxu1 %v2149_v0 }
  0x50   : > { %1773 = vmatpush3.msra.mxu0 %v2352_v15  ;;  %1784 = vmatpush3.msra.mxu1 %v2354_v16  ;;  %p2067_p5 = pnand %p2066_p3, %p2060_p12 }
  0x51   : > { %1774 = vmatprep.subr.mxu0 %v2149_v0  ;;  %1785 = vmatprep.subr.mxu1 %v2149_v0 }
  0x52   : > { %1775 = vmatpush3.msra.mxu0 %v2360_v17  ;;  %1776 = vmatprep.mubr.msk.f32.mxu0 %vm2150_vm0, %v2149_v0 }
  0x53   : > { %1786 = vmatpush3.msra.mxu1 %v2364_v18  ;;  %1777 = vmatmul.mubr.msk.f32.vlgmr.msra.gmra.mxu0 %vm222_vm1, %v1628_v19 }
  0x54   : > { %1787 = vmatprep.mubr.msk.f32.mxu1 %vm2150_vm0, %v2149_v0  ;;  %1790 = vmatprep.subr.mxu0 %v2149_v0 }
  0x55   : > { %1801 = vmatprep.subr.mxu1 %v2149_v0  ;;  %1788 = vmatmul.mubr.msk.f32.vlgmr.msra.gmra.mxu1 %vm222_vm1, %v1630_v20 }
  0x56   : > { %1791 = vmatpush3.msra.mxu0 %v2304_v1  ;;  %1802 = vmatpush3.msra.mxu1 %v2306_v2 }
  0x57   : > { %1792 = vmatprep.subr.mxu0 %v2149_v0  ;;  %1803 = vmatprep.subr.mxu1 %v2149_v0 }
  0x58   : > { %1793 = vmatpush3.msra.mxu0 %v2308_v3  ;;  %1804 = vmatpush3.msra.mxu1 %v2312_v4 }
  0x59   : > { %1794 = vmatprep.subr.mxu0 %v2149_v0  ;;  %1805 = vmatprep.subr.mxu1 %v2149_v0 }
  0x5a   : > { %1795 = vmatpush3.msra.mxu0 %v2316_v5  ;;  %1806 = vmatpush3.msra.mxu1 %v2318_v6 }
  0x5b   : > { %1796 = vmatprep.subr.mxu0 %v2149_v0  ;;  %1807 = vmatprep.subr.mxu1 %v2149_v0 }
  0x5c   : > { %1797 = vmatpush3.msra.mxu0 %v2324_v7  ;;  %1798 = vmatprep.mubr.msk.f32.mxu0 %vm2150_vm0, %v2149_v0 }
  0x5d   : > { %1808 = vmatpush3.msra.mxu1 %v2326_v8  ;;  %1799 = vmatmul.mubr.msk.f32.vlgmr.msra.gmra.mxu0 %vm222_vm1, %v1633_v21 }
  0x5e   : > { %1809 = vmatprep.mubr.msk.f32.mxu1 %vm2150_vm0, %v2149_v0  ;;  %1812 = vmatprep.subr.mxu0 %v2149_v0 }
  0x5f   : > { %1823 = vmatprep.subr.mxu1 %v2149_v0  ;;  %1810 = vmatmul.mubr.msk.f32.vlgmr.msra.gmra.mxu1 %vm222_vm1, %v1632_v22 }
  0x60   : > { %1813 = vmatpush3.msra.mxu0 %v2336_v11  ;;  %1824 = vmatpush3.msra.mxu1 %v2338_v12 }
  0x61   : > { %1814 = vmatprep.subr.mxu0 %v2149_v0  ;;  %1825 = vmatprep.subr.mxu1 %v2149_v0 }
  0x62   : > { %1815 = vmatpush3.msra.mxu0 %v2344_v13  ;;  %1826 = vmatpush3.msra.mxu1 %v2346_v14 }
  0x63   : > { %1816 = vmatprep.subr.mxu0 %v2149_v0  ;;  %1827 = vmatprep.subr.mxu1 %v2149_v0 }
  0x64   : > { %1817 = vmatpush3.msra.mxu0 %v2352_v15  ;;  %1828 = vmatpush3.msra.mxu1 %v2354_v16 }
  0x65   : > { %1818 = vmatprep.subr.mxu0 %v2149_v0  ;;  %1829 = vmatprep.subr.mxu1 %v2149_v0 }
  0x66   : > { %1819 = vmatpush3.msra.mxu0 %v2360_v17  ;;  %1820 = vmatprep.mubr.msk.f32.mxu0 %vm2150_vm0, %v2149_v0 }
  0x67   : > { %1830 = vmatpush3.msra.mxu1 %v2364_v18  ;;  %1821 = vmatmul.mubr.msk.f32.vlgmr.msra.gmra.mxu0 %vm222_vm1, %v1636_v23 }
  0x68   : > { %1831 = vmatprep.mubr.msk.f32.mxu1 %vm2150_vm0, %v2149_v0  ;;  %1834 = vmatprep.subr.mxu0 %v2149_v0 }
  0x69   : > { %1845 = vmatprep.subr.mxu1 %v2149_v0  ;;  %1832 = vmatmul.mubr.msk.f32.vlgmr.msra.gmra.mxu1 %vm222_vm1, %v1638_v24 }
  0x6a   : > { %1835 = vmatpush3.msra.mxu0 %v2304_v1  ;;  %1846 = vmatpush3.msra.mxu1 %v2306_v2 }
  0x6b   : > { %1836 = vmatprep.subr.mxu0 %v2149_v0  ;;  %1847 = vmatprep.subr.mxu1 %v2149_v0 }
  0x6c   : > { %1837 = vmatpush3.msra.mxu0 %v2308_v3  ;;  %1848 = vmatpush3.msra.mxu1 %v2312_v4 }
  0x6d   : > { %1838 = vmatprep.subr.mxu0 %v2149_v0  ;;  %1849 = vmatprep.subr.mxu1 %v2149_v0 }
  0x6e   : > { %1839 = vmatpush3.msra.mxu0 %v2316_v5  ;;  %1850 = vmatpush3.msra.mxu1 %v2318_v6 }
  0x6f   : > { %1840 = vmatprep.subr.mxu0 %v2149_v0  ;;  %1851 = vmatprep.subr.mxu1 %v2149_v0 }
  0x70   : > { %1841 = vmatpush3.msra.mxu0 %v2324_v7  ;;  %1842 = vmatprep.mubr.msk.f32.mxu0 %vm2150_vm0, %v2149_v0 }
  0x71   : > { %1852 = vmatpush3.msra.mxu1 %v2326_v8  ;;  %1843 = vmatmul.mubr.msk.f32.vlgmr.msra.gmra.mxu0 %vm222_vm1, %v1642_v25 }
  0x72   : > { %1853 = vmatprep.mubr.msk.f32.mxu1 %vm2150_vm0, %v2149_v0  ;;  %1856 = vmatprep.subr.mxu0 %v2149_v0 }
  0x73   : > { %1867 = vmatprep.subr.mxu1 %v2149_v0  ;;  %1854 = vmatmul.mubr.msk.f32.vlgmr.msra.gmra.mxu1 %vm222_vm1, %v1641_v26 }
  0x74   : > { %1857 = vmatpush3.msra.mxu0 %v2336_v11  ;;  %1868 = vmatpush3.msra.mxu1 %v2338_v12 }
  0x75   : > { %1858 = vmatprep.subr.mxu0 %v2149_v0  ;;  %1869 = vmatprep.subr.mxu1 %v2149_v0 }
  0x76   : > { %1859 = vmatpush3.msra.mxu0 %v2344_v13  ;;  %1870 = vmatpush3.msra.mxu1 %v2346_v14 }
  0x77   : > { %1860 = vmatprep.subr.mxu0 %v2149_v0  ;;  %1871 = vmatprep.subr.mxu1 %v2149_v0 }
  0x78   : > { %1861 = vmatpush3.msra.mxu0 %v2352_v15  ;;  %1872 = vmatpush3.msra.mxu1 %v2354_v16 }
  0x79   : > { %1862 = vmatprep.subr.mxu0 %v2149_v0  ;;  %1873 = vmatprep.subr.mxu1 %v2149_v0 }
  0x7a   : > { %1863 = vmatpush3.msra.mxu0 %v2360_v17  ;;  %1864 = vmatprep.mubr.msk.f32.mxu0 %vm2150_vm0, %v2149_v0 }
  0x7b   : > { %1874 = vmatpush3.msra.mxu1 %v2364_v18  ;;  %1865 = vmatmul.mubr.msk.f32.vlgmr.msra.gmra.mxu0 %vm222_vm1, %v1645_v27 }
  0x7c   : > { %1875 = vmatprep.mubr.msk.f32.mxu1 %vm2150_vm0, %v2149_v0  ;;  %1878 = vmatprep.subr.mxu0 %v2149_v0 }
  0x7d   : > { %1889 = vmatprep.subr.mxu1 %v2149_v0  ;;  %1876 = vmatmul.mubr.msk.f32.vlgmr.msra.gmra.mxu1 %vm222_vm1, %v1647_v28 }
  0x7e   : > { %1879 = vmatpush3.msra.mxu0 %v2304_v1  ;;  %1890 = vmatpush3.msra.mxu1 %v2306_v2 }
  0x7f   : > { %1880 = vmatprep.subr.mxu0 %v2149_v0  ;;  %1891 = vmatprep.subr.mxu1 %v2149_v0 }
  0x80   : > { %1881 = vmatpush3.msra.mxu0 %v2308_v3  ;;  %1892 = vmatpush3.msra.mxu1 %v2312_v4 }
  0x81   : > { %1882 = vmatprep.subr.mxu0 %v2149_v0  ;;  %1893 = vmatprep.subr.mxu1 %v2149_v0 }
  0x82   : > { %1883 = vmatpush3.msra.mxu0 %v2316_v5  ;;  %1894 = vmatpush3.msra.mxu1 %v2318_v6 }
  0x83   : > { %1884 = vmatprep.subr.mxu0 %v2149_v0  ;;  %1895 = vmatprep.subr.mxu1 %v2149_v0 }
  0x84   : > { %1885 = vmatpush3.msra.mxu0 %v2324_v7  ;;  %1886 = vmatprep.mubr.msk.f32.mxu0 %vm2150_vm0, %v2149_v0 }
  0x85   : > { %1896 = vmatpush3.msra.mxu1 %v2326_v8  ;;  %1887 = vmatmul.mubr.msk.f32.vlgmr.msra.gmra.mxu0 %vm222_vm1, %v1651_v29 }
  0x86   : > { %1897 = vmatprep.mubr.msk.f32.mxu1 %vm2150_vm0, %v2149_v0  ;;  %1900 = vmatprep.subr.mxu0 %v2149_v0 }
  0x87   : > { %1911 = vmatprep.subr.mxu1 %v2149_v0  ;;  %1898 = vmatmul.mubr.msk.f32.vlgmr.msra.gmra.mxu1 %vm222_vm1, %v1650_v30 }
  0x88   : > { %1901 = vmatpush3.msra.mxu0 %v2336_v11  ;;  %1912 = vmatpush3.msra.mxu1 %v2338_v12 }
  0x89   : > { %1902 = vmatprep.subr.mxu0 %v2149_v0  ;;  %1913 = vmatprep.subr.mxu1 %v2149_v0 }
  0x8a   : > { %1903 = vmatpush3.msra.mxu0 %v2344_v13  ;;  %1914 = vmatpush3.msra.mxu1 %v2346_v14 }
  0x8b   : > { %1904 = vmatprep.subr.mxu0 %v2149_v0  ;;  %1915 = vmatprep.subr.mxu1 %v2149_v0 }
  0x8c   : > { %1905 = vmatpush3.msra.mxu0 %v2352_v15  ;;  %1916 = vmatpush3.msra.mxu1 %v2354_v16 }
  0x8d   : > { %1906 = vmatprep.subr.mxu0 %v2149_v0  ;;  %1917 = vmatprep.subr.mxu1 %v2149_v0 }
  0x8e   : > { %1907 = vmatpush3.msra.mxu0 %v2360_v17  ;;  %1908 = vmatprep.mubr.msk.f32.mxu0 %vm2150_vm0, %v2149_v0 }
  0x8f   : > { %1918 = vmatpush3.msra.mxu1 %v2364_v18  ;;  %1919 = vmatprep.mubr.msk.f32.mxu1 %vm2150_vm0, %v2149_v0 }
  0x90   : > { %1909 = vmatmul.mubr.msk.f32.vlgmr.msra.gmra.mxu0 %vm222_vm1, %v1654_v31  ;;  %1920 = vmatmul.mubr.msk.f32.vlgmr.msra.gmra.mxu1 %vm222_vm1, %v1656_v32 }
 0x10a   : > { %v292_v33 = vpop.f32.mrf.mxu0 }
 0x10b   : > { %v365_v34 = vpop.f32.mrf.mxu1 }
 0x10c   : > { %v1756_v35 = vpop.f32.mrf.mxu0  ;;  %v366_v37 = vadd.f32 %v365_v34, %v292_v33 }
 0x10d   : > { %v1767_v36 = vpop.f32.mrf.mxu1 }
 0x113   : > { %v445_v38 = vpop.f32.mrf.mxu0 }
 0x114   : > { %v449_v39 = vadd.f32 %v445_v38, %v366_v37 }
 0x115   : > { %v526_v40 = vpop.f32.mrf.mxu1  ;;  %v1778_v41 = vpop.f32.mrf.mxu0 }
 0x116   : > { %v530_v42 = vadd.f32 %v526_v40, %v449_v39 }
 0x117   : > { %v1789_v43 = vpop.f32.mrf.mxu1 }
 0x118   : > { %531 = vst [vmem:[%s2523_s19] sm:$0x3] %v530_v42 }
 0x11d   : > { %v613_v44 = vpop.f32.mrf.mxu0 }
 0x11f   : > { %v686_v45 = vpop.f32.mrf.mxu1  ;;  %v1800_v46 = vpop.f32.mrf.mxu0 }
 0x120   : > { %v687_v48 = vadd.f32 %v686_v45, %v613_v44 }
 0x121   : > { %v1811_v47 = vpop.f32.mrf.mxu1 }
 0x127   : > { %v765_v49 = vpop.f32.mrf.mxu0 }
 0x128   : > { %v769_v50 = vadd.f32 %v765_v49, %v687_v48 }
 0x129   : > { %v845_v51 = vpop.f32.mrf.mxu1  ;;  %v1822_v52 = vpop.f32.mrf.mxu0 }
 0x12a   : > { %v849_v53 = vadd.f32 %v845_v51, %v769_v50 }
 0x12b   : > { %v1833_v54 = vpop.f32.mrf.mxu1 }
 0x12c   : > { %1640 = vst [vmem:[%s2523_s19 + $0x2] sm:$0x3] %v849_v53 }
 0x131   : > { %v933_v55 = vpop.f32.mrf.mxu0 }
 0x133   : > { %v1006_v56 = vpop.f32.mrf.mxu1  ;;  %v1844_v57 = vpop.f32.mrf.mxu0 }
 0x134   : > { %v1007_v59 = vadd.f32 %v1006_v56, %v933_v55 }
 0x135   : > { %v1855_v58 = vpop.f32.mrf.mxu1 }
 0x13b   : > { %v1085_v60 = vpop.f32.mrf.mxu0 }
 0x13c   : > { %v1089_v61 = vadd.f32 %v1085_v60, %v1007_v59 }
 0x13d   : > { %v1165_v62 = vpop.f32.mrf.mxu1  ;;  %v1866_v63 = vpop.f32.mrf.mxu0 }
 0x13e   : > { %v1169_v0 = vadd.f32 %v1165_v62, %v1089_v61 }
 0x13f   : > { %v1877_v1 = vpop.f32.mrf.mxu1 }
 0x140   : > { %1649 = vst [vmem:[%s2523_s19 + $0x4] sm:$0x3] %v1169_v0 }
 0x145   : > { %v1253_v2 = vpop.f32.mrf.mxu0 }
 0x147   : > { %v1326_v3 = vpop.f32.mrf.mxu1  ;;  %v1888_v4 = vpop.f32.mrf.mxu0 }
 0x148   : > { %v1327_v6 = vadd.f32 %v1326_v3, %v1253_v2 }
 0x149   : > { %v1899_v5 = vpop.f32.mrf.mxu1 }
 0x150   : > { %v1405_v7 = vpop.f32.mrf.mxu0  ;;  %v1485_v8 = vpop.f32.mrf.mxu1 }
 0x151   : > { %v1409_v9 = vadd.f32 %v1405_v7, %v1327_v6 }
 0x152   : > { %v1910_v10 = vpop.f32.mrf.mxu0  ;;  %v1921_v11 = vpop.f32.mrf.mxu1 }
 0x153   : > { %v1489_v12 = vadd.f32 %v1485_v8, %v1409_v9 }
 0x155   : > { %1658 = vst [vmem:[%s2523_s19 + $0x6] sm:$0x3] %v1489_v12 }
 0x156   : > { %2070 = shalt.err (!%p2067_p5)
}
 0x157   : > { %s2071_s6 = scalar_lea.hbm %s2535_s18, 128  ;;  %s2075_s16 = scalar_lea.hbm %s2586_s2, 256 }
 0x158   : > { %p2072_p7 = scmp.ne.s32.totalorder %s2535_s18, %s2071_s6  ;;  %p2076_p9 = scmp.lt.s32.totalorder %s2535_s18, %s2586_s2 }
 0x159   : > { %p2077_p11 = scmp.lt.s32.totalorder %s2075_s16, %s2071_s6 }
 0x15a   : > { %p2073_p6 = pnand %p2072_p7, %p2256_p13 }
 0x15b   : > { %p2078_p10 = por %p2077_p11, %p2076_p9 }
 0x15c   : > { %p2074_p4 = pneg %p2073_p6 }
 0x15e   : > { %p2079_p1 = pnand %p2078_p10, %p2074_p4 }
 0x160   : > { %2082 = shalt.err (!%p2079_p1)
}
 0x161   : > { %s2152_s17 = smov 32   ;;  %s2153_s19 = smov 2  }
 0x162   : > { %1928 = dma.vmem_to_hbm [thread:$0]  (%p2256_p13), %s2530_s21, 128, %s2535_s18, %s1493_s28, %s2152_s17, %s2152_s17, %s2153_s19  }
 0x163 PF: > { %s1524_s24 = sand.u32 1, %s2121_s9   ;;  %p2598_p8 = scmp.ne.s32.totalorder %s2591_s20, 0 }
 0x164   : > { %p2599_p12 = scmp.ge.s32.totalorder %s2141_s14, 2  ;;  %s1525_s26 = scalar_lea.sflag [#allocation4], %s1524_s24 }
 0x166   : > { %p1939_p0 = pnand %p2599_p12, %p2598_p8 }
 0x168   : > { %p1940_p2 = pneg %p1939_p0 }
 0x16a   : > { %2116 = dma.done.wait (%p1940_p2), %s1525_s26, 128  }
 0x16b   : > { %2118 = vsyncadd (%p1940_p2), %s1525_s26, 4294967168  ;;  %s19_s14 = sadd.s32 1, %s2141_s14   ;;  %s2600_s9 = smov %s2125_s10 }
 0x16c   : > { %p16_p3 = scmp.ge.s32.totalorder %s19_s14, 4   ;;  %s2601_s10 = smov %s2129_s11 }
 0x16d   : > { %s2602_s11 = smov %s2265_s15  ;;  %s2603_s12 = smov %s2137_s13 }
 0x16e   : > { %s2604_s13 = smov %s2606_s25  ;;  %18 = sbr.rel (!%p16_p3) target bundleno = 7 (0x7), region = 99 }
 0x173   :  { %1530 = vsyncpa [#allocation3], 1 }
 0x174   :  { %1532 = vsyncpa [#allocation3 + $0x1], 1 }
 0x175   :  { %1533 = vsyncpa [#allocation6], 1 }
 0x176   :  { %1535 = vsyncpa [#allocation6 + $0x1], 1 }
 0x177   :  { %1536 = vsyncpa [#allocation4], 1 }
 0x178   :  { %1538 = vsyncpa [#allocation4 + $0x1], 1 }

</bundles_post_ra>
